<compile_context>
chip_gen: v7x
topology: tpu7x:2x2x1
jax: 0.10.0
libtpu: 0.0.40
codegen_flags: <defaults>
</compile_context>

<pallas_src>
import jax
import jax.numpy as jnp
from jax.experimental import pallas as pl
from jax.experimental.pallas import tpu as pltpu


def _round_up(n, k):
    return ((n + k - 1) // k) * k


def _ensemble_kernel(x_ref, w_ref, b_ref, o_ref):
    """Single grid step; everything resides in VMEM.

    x_ref : (B_pad, D)  bf16  -- flattened, sublane-padded inputs
    w_ref : (D, K)      bf16  -- pre-averaged ensemble weight (mean over M)
    b_ref : (1, K)      f32   -- pre-averaged ensemble bias
    o_ref : (B_pad, K)  f32   -- ensemble logits
    """
    logits = jnp.dot(x_ref[...], w_ref[...], preferred_element_type=jnp.float32)
    o_ref[...] = logits + b_ref[...]


def make_ensemble_params(weights, biases):
    """One-time, cacheable reduction of the member parameters.

    weights: (M, D, K) f32, biases: (M, K) f32
    Returns (w_mean (D, K) bf16, b_mean (1, K) f32).

    In the normal attack loop the member models are fixed, so this runs once
    and the per-call kernel only streams a single (D, K) weight matrix.
    """
    w_mean = jnp.mean(weights.astype(jnp.float32), axis=0).astype(jnp.bfloat16)
    b_mean = jnp.mean(biases.astype(jnp.float32), axis=0, keepdims=True)
    return w_mean, b_mean


def ensemble_apply(x_nchw, w_mean, b_mean):
    """Per-call forward: flatten x, pad batch rows to a sublane multiple,
    run one bf16 MXU matmul with f32 accumulation + bias."""
    B = x_nchw.shape[0]
    D, K = w_mean.shape

    B_pad = _round_up(max(B, 8), 8)  # sublane-dense LHS rows

    x_flat = x_nchw.reshape(B, D)  # matches torch .view(B, -1)
    x_p = jnp.pad(x_flat, ((0, B_pad - B), (0, 0))).astype(jnp.bfloat16)

    out_p = pl.pallas_call(
        _ensemble_kernel,
        out_shape=jax.ShapeDtypeStruct((B_pad, K), jnp.float32),
        grid_spec=pltpu.PrefetchScalarGridSpec(
            num_scalar_prefetch=0,
            grid=(1,),  # all operands fit comfortably in VMEM -> single step
            in_specs=[
                pl.BlockSpec((B_pad, D), lambda i: (0, 0)),  # x (full block)
                pl.BlockSpec((D, K), lambda i: (0, 0)),      # mean weight, real K
                pl.BlockSpec((1, K), lambda i: (0, 0)),      # mean bias
            ],
            out_specs=pl.BlockSpec((B_pad, K), lambda i: (0, 0)),
        ),
        compiler_params=pltpu.CompilerParams(
            dimension_semantics=("arbitrary",),
        ),
    )(x_p, w_mean, b_mean)

    return out_p[:B, :]


def ensemble_forward(x_nchw, weights, biases):
    """Module-equivalent forward taking the raw member parameters.

    When calling repeatedly with fixed members, cache make_ensemble_params()
    outside the loop (as done in __main__) so only the GEMM runs per call.
    """
    w_mean, b_mean = make_ensemble_params(weights, biases)
    return ensemble_apply(x_nchw, w_mean, b_mean)


def ensemble_forward_ref(x_nchw, weights, biases):
    """Pure-JAX f32 reference mirroring the PyTorch forward exactly."""
    B = x_nchw.shape[0]
    M = weights.shape[0]
    xf = x_nchw.reshape(B, -1)
    out = 0.0
    for m in range(M):
        out = out + (1.0 / M) * (xf @ weights[m] + biases[m])
    return out


if __name__ == "__main__":
    # Small, deterministic setup: batch=2, channels=4, spatial=16x16,
    # M=3 ensemble members, K=32 output classes.
    B, C, H, W = 2, 4, 16, 16
    D = C * H * W
    M, K = 3, 32

    key = jax.random.PRNGKey(0)
    kx, kw, kb = jax.random.split(key, 3)

    x = jax.random.normal(kx, (B, C, H, W), dtype=jnp.float32)
    # Deterministic synthetic member parameters (nn.Linear-like scale).
    weights = jax.random.normal(kw, (M, D, K), dtype=jnp.float32) * (1.0 / D**0.5)
    biases = jax.random.normal(kb, (M, K), dtype=jnp.float32) * 0.01

    # One-time cached ensemble reduction (reused across calls in a real loop).
    w_mean, b_mean = make_ensemble_params(weights, biases)
    w_mean = jax.block_until_ready(w_mean)
    b_mean = jax.block_until_ready(b_mean)

    out = ensemble_apply(x, w_mean, b_mean)
    out = jax.block_until_ready(out)

    ref = ensemble_forward_ref(x, weights, biases)
    assert out.shape == (B, K)
    # Tolerance accounts for bf16 quantization of x and mean(W) on the MXU
    # (accumulation stays in f32); the reference is pure f32.
    assert jnp.allclose(out, ref, atol=5e-2, rtol=5e-2), "mismatch vs reference"

    print("KERNEL_OK")
</pallas_src>

<mosaic_0001>
module attributes {stable_mosaic.version = 11 : i64} {
  func.func @_ensemble_kernel(%arg0: i32, %arg1: memref<8x1024xbf16, #tpu.memory_space<vmem>>, %arg2: memref<1024x32xbf16, #tpu.memory_space<vmem>>, %arg3: memref<1x32xf32, #tpu.memory_space<vmem>>, %arg4: memref<8x32xf32, #tpu.memory_space<vmem>>) attributes {dimension_semantics = [#tpu.dimension_semantics<arbitrary>], iteration_bounds = array<i64: 1>, scalar_prefetch = 0 : i64, scratch_operands = 0 : i64, tpu.core_type = #tpu.core_type<tc>, window_params = [{pipeline_mode = #tpu.pipeline_mode<synchronous>, transform_indices = @transform_0, window_bounds = array<i64: 8, 1024>}, {pipeline_mode = #tpu.pipeline_mode<synchronous>, transform_indices = @transform_1, window_bounds = array<i64: 1024, 32>}, {pipeline_mode = #tpu.pipeline_mode<synchronous>, transform_indices = @transform_2, window_bounds = array<i64: 1, 32>}, {pipeline_mode = #tpu.pipeline_mode<synchronous>, transform_indices = @transform_3, window_bounds = array<i64: 8, 32>}]} {
    %c0 = arith.constant 0 : index
    %c0_0 = arith.constant 0 : index
    %0 = vector.load %arg1[%c0, %c0_0] : memref<8x1024xbf16, #tpu.memory_space<vmem>>, vector<8x1024xbf16>
    %c0_1 = arith.constant 0 : index
    %c0_2 = arith.constant 0 : index
    %1 = vector.load %arg2[%c0_1, %c0_2] : memref<1024x32xbf16, #tpu.memory_space<vmem>>, vector<1024x32xbf16>
    %cst = arith.constant dense<0.000000e+00> : vector<8x32xf32>
    %2 = tpu.matmul %0, %1, %cst {dimension_numbers = #tpu.dot_dimension_numbers<[1], [0], [0], [1], [0, 0, 1, 1], [], []>} : vector<8x1024xbf16>, vector<1024x32xbf16>, vector<8x32xf32> -> vector<8x32xf32>
    %c0_3 = arith.constant 0 : index
    %c0_4 = arith.constant 0 : index
    %3 = vector.load %arg3[%c0_3, %c0_4] : memref<1x32xf32, #tpu.memory_space<vmem>>, vector<1x32xf32>
    %4 = vector.broadcast %3 : vector<1x32xf32> to vector<8x32xf32>
    %5 = arith.addf %2, %4 : vector<8x32xf32>
    %c0_5 = arith.constant 0 : index
    %c0_6 = arith.constant 0 : index
    %6 = vector.load %arg4[%c0_5, %c0_6] : memref<8x32xf32, #tpu.memory_space<vmem>>, vector<8x32xf32>
    tpu.vector_store %arg4[%c0_5, %c0_6], %5 {strides = array<i32>} : memref<8x32xf32, #tpu.memory_space<vmem>>, vector<8x32xf32>,
    return
  }
  func.func @transform_0(%arg0: i32) -> (i32, i32) {
    %c0_i32 = arith.constant 0 : i32
    %c0_i32_0 = arith.constant 0 : i32
    %c0_i32_1 = arith.constant 0 : i32
    return %c0_i32, %c0_i32_0 : i32, i32
  }
  func.func @transform_1(%arg0: i32) -> (i32, i32) {
    %c0_i32 = arith.constant 0 : i32
    %c0_i32_0 = arith.constant 0 : i32
    %c0_i32_1 = arith.constant 0 : i32
    return %c0_i32, %c0_i32_0 : i32, i32
  }
  func.func @transform_2(%arg0: i32) -> (i32, i32) {
    %c0_i32 = arith.constant 0 : i32
    %c0_i32_0 = arith.constant 0 : i32
    %c0_i32_1 = arith.constant 0 : i32
    return %c0_i32, %c0_i32_0 : i32, i32
  }
  func.func @transform_3(%arg0: i32) -> (i32, i32) {
    %c0_i32 = arith.constant 0 : i32
    %c0_i32_0 = arith.constant 0 : i32
    %c0_i32_1 = arith.constant 0 : i32
    return %c0_i32, %c0_i32_0 : i32, i32
  }
}

</mosaic_0001>

<bundles_post_ra>
// kernel: tpu_custom_call.1
= control target key start
LH: loop header
LB: loop body
LE: loop exit
PB: predicated region body
PF: predicated region fallthrough
CT: control target
= control target key end

     0   :  { %s1241_s0 = inlined_call_operand.vmem [shape: bf16[8,1024], index: 0, kind: input, shape index: {}]   ;;  %s1242_s1 = inlined_call_operand.vmem [shape: bf16[1024,32], index: 1, kind: input, shape index: {}]   ;;  %s1243_s2 = inlined_call_operand.vmem [shape: f32[1,32], index: 2, kind: input, shape index: {}]   ;;  %s1244_s3 = inlined_call_operand.hbm [shape: f32[8,32], index: 3, kind: output, shape index: {}]  }
   0x1   :  { %v905_v0 = vld [vmem:[%s1242_s1 + $0x40] sm:$0xff]   ;;  %v909_v4 = vld [vmem:[%s1242_s1 + $0x48] sm:$0xff]   ;;  %v913_v8 = vld [vmem:[%s1242_s1 + $0x50] sm:$0xff]  }
   0x2   :  { %v906_v1 = vld [vmem:[%s1242_s1 + $0xc0] sm:$0xff]   ;;  %816 = vmatprep.subr.bf16.mxu0 %v905_v0  ;;  %v910_v5 = vld [vmem:[%s1242_s1 + $0xc8] sm:$0xff]   ;;  %v914_v9 = vld [vmem:[%s1242_s1 + $0xd0] sm:$0xff]  }
   0x3   :  { %v907_v2 = vld [vmem:[%s1242_s1] sm:$0xff]   ;;  %838 = vmatprep.subr.bf16.mxu1 %v906_v1  ;;  %v911_v6 = vld [vmem:[%s1242_s1 + $0x8] sm:$0xff]   ;;  %v915_v10 = vld [vmem:[%s1242_s1 + $0x10] sm:$0xff]  }
   0x4   :  { %v908_v3 = vld [vmem:[%s1242_s1 + $0x80] sm:$0xff]   ;;  %817 = vmatpush3.bf16.msra.mxu0 %v907_v2  ;;  %v912_v7 = vld [vmem:[%s1242_s1 + $0x88] sm:$0xff]   ;;  %v916_v11 = vld [vmem:[%s1242_s1 + $0x90] sm:$0xff]  }
   0x5   :  { %839 = vmatpush3.bf16.msra.mxu1 %v908_v3  ;;  %818 = vmatprep.subr.bf16.mxu0 %v909_v4  ;;  %v917_v12 = vld [vmem:[%s1242_s1 + $0x58] sm:$0xff]   ;;  %v921_v16 = vld [vmem:[%s1242_s1 + $0x60] sm:$0xff]   ;;  %v925_v20 = vld [vmem:[%s1242_s1 + $0x68] sm:$0xff]  }
   0x6   :  { %840 = vmatprep.subr.bf16.mxu1 %v910_v5  ;;  %v918_v13 = vld [vmem:[%s1242_s1 + $0xd8] sm:$0xff]   ;;  %v922_v17 = vld [vmem:[%s1242_s1 + $0xe0] sm:$0xff]   ;;  %v926_v21 = vld [vmem:[%s1242_s1 + $0xe8] sm:$0xff]  }
   0x7   :  { %v919_v14 = vld [vmem:[%s1242_s1 + $0x18] sm:$0xff]   ;;  %v923_v18 = vld [vmem:[%s1242_s1 + $0x20] sm:$0xff]   ;;  %v927_v22 = vld [vmem:[%s1242_s1 + $0x28] sm:$0xff]  }
   0x8   :  { %819 = vmatpush3.bf16.msra.mxu0 %v911_v6  ;;  %v920_v15 = vld [vmem:[%s1242_s1 + $0x98] sm:$0xff]   ;;  %v924_v19 = vld [vmem:[%s1242_s1 + $0xa0] sm:$0xff]   ;;  %v928_v23 = vld [vmem:[%s1242_s1 + $0xa8] sm:$0xff]  }
   0x9   :  { %841 = vmatpush3.bf16.msra.mxu1 %v912_v7  ;;  %820 = vmatprep.subr.bf16.mxu0 %v913_v8  ;;  %v929_v24 = vld [vmem:[%s1242_s1 + $0x70] sm:$0xff]   ;;  %v933_v28 = vld [vmem:[%s1242_s1 + $0x78] sm:$0xff]   ;;  %v16_v32 = vld [vmem:[%s1241_s0] sm:$0xff] }
   0xa   :  { %842 = vmatprep.subr.bf16.mxu1 %v914_v9  ;;  %v930_v25 = vld [vmem:[%s1242_s1 + $0xf0] sm:$0xff]   ;;  %v934_v29 = vld [vmem:[%s1242_s1 + $0xf8] sm:$0xff]   ;;  %v17_v33 = vld [vmem:[%s1241_s0 + $0x8] sm:$0xff]  ;;  %v744_v34 = vcombine.low %v16_v32, %v16_v32  ;;  %v745_v35 = vcombine.high %v16_v32, %v16_v32 }
   0xb   :  { %v931_v26 = vld [vmem:[%s1242_s1 + $0x30] sm:$0xff]   ;;  %v935_v30 = vld [vmem:[%s1242_s1 + $0x38] sm:$0xff]   ;;  %v746_v36 = vcombine.low %v17_v33, %v17_v33  ;;  %v747_v37 = vcombine.high %v17_v33, %v17_v33  ;;  %v941_v38 = vld [vmem:[%s1242_s1 + $0x140] sm:$0xff]  }
   0xc   :  { %821 = vmatpush3.bf16.msra.mxu0 %v915_v10  ;;  %v932_v27 = vld [vmem:[%s1242_s1 + $0xb0] sm:$0xff]   ;;  %v936_v31 = vld [vmem:[%s1242_s1 + $0xb8] sm:$0xff]   ;;  %v942_v39 = vld [vmem:[%s1242_s1 + $0x1c0] sm:$0xff]   ;;  %599 = vmatprep.mubr.bf16.mxu0 %v745_v35 }
   0xd   :  { %843 = vmatpush3.bf16.msra.mxu1 %v916_v11  ;;  %822 = vmatprep.subr.bf16.mxu0 %v917_v12  ;;  %v943_v40 = vld [vmem:[%s1242_s1 + $0x100] sm:$0xff]   ;;  %v945_v42 = vld [vmem:[%s1242_s1 + $0x148] sm:$0xff]   ;;  %v949_v46 = vld [vmem:[%s1242_s1 + $0x150] sm:$0xff]  }
   0xe   :  { %844 = vmatprep.subr.bf16.mxu1 %v918_v13  ;;  %639 = vmatprep.mubr.bf16.mxu1 %v747_v37  ;;  %v944_v41 = vld [vmem:[%s1242_s1 + $0x180] sm:$0xff]   ;;  %v946_v43 = vld [vmem:[%s1242_s1 + $0x1c8] sm:$0xff]   ;;  %v950_v47 = vld [vmem:[%s1242_s1 + $0x1d0] sm:$0xff]  }
   0xf   :  { %v947_v44 = vld [vmem:[%s1242_s1 + $0x108] sm:$0xff]   ;;  %v951_v48 = vld [vmem:[%s1242_s1 + $0x110] sm:$0xff]   ;;  %v953_v50 = vld [vmem:[%s1242_s1 + $0x158] sm:$0xff]  }
  0x10   :  { %823 = vmatpush3.bf16.msra.mxu0 %v919_v14  ;;  %v948_v45 = vld [vmem:[%s1242_s1 + $0x188] sm:$0xff]   ;;  %v952_v49 = vld [vmem:[%s1242_s1 + $0x190] sm:$0xff]   ;;  %v954_v51 = vld [vmem:[%s1242_s1 + $0x1d8] sm:$0xff]  }
  0x11   :  { %845 = vmatpush3.bf16.msra.mxu1 %v920_v15  ;;  %824 = vmatprep.subr.bf16.mxu0 %v921_v16  ;;  %v955_v52 = vld [vmem:[%s1242_s1 + $0x118] sm:$0xff]   ;;  %v957_v54 = vld [vmem:[%s1242_s1 + $0x160] sm:$0xff]   ;;  %v961_v58 = vld [vmem:[%s1242_s1 + $0x168] sm:$0xff]  }
  0x12   :  { %846 = vmatprep.subr.bf16.mxu1 %v922_v17  ;;  %v956_v53 = vld [vmem:[%s1242_s1 + $0x198] sm:$0xff]   ;;  %v958_v55 = vld [vmem:[%s1242_s1 + $0x1e0] sm:$0xff]   ;;  %v962_v59 = vld [vmem:[%s1242_s1 + $0x1e8] sm:$0xff]  }
  0x13   :  { %v959_v56 = vld [vmem:[%s1242_s1 + $0x120] sm:$0xff]   ;;  %v963_v60 = vld [vmem:[%s1242_s1 + $0x128] sm:$0xff]   ;;  %v965_v62 = vld [vmem:[%s1242_s1 + $0x170] sm:$0xff]  }
  0x14   :  { %825 = vmatpush3.bf16.msra.mxu0 %v923_v18  ;;  %v960_v57 = vld [vmem:[%s1242_s1 + $0x1a0] sm:$0xff]   ;;  %v964_v61 = vld [vmem:[%s1242_s1 + $0x1a8] sm:$0xff]   ;;  %v966_v63 = vld [vmem:[%s1242_s1 + $0x1f0] sm:$0xff]  }
  0x15   :  { %847 = vmatpush3.bf16.msra.mxu1 %v924_v19  ;;  %826 = vmatprep.subr.bf16.mxu0 %v925_v20  ;;  %v967_v0 = vld [vmem:[%s1242_s1 + $0x130] sm:$0xff]   ;;  %v969_v2 = vld [vmem:[%s1242_s1 + $0x178] sm:$0xff]  }
  0x16   :  { %848 = vmatprep.subr.bf16.mxu1 %v926_v21  ;;  %v968_v1 = vld [vmem:[%s1242_s1 + $0x1b0] sm:$0xff]   ;;  %v970_v3 = vld [vmem:[%s1242_s1 + $0x1f8] sm:$0xff]  }
  0x17   :  { %v971_v4 = vld [vmem:[%s1242_s1 + $0x138] sm:$0xff]   ;;  %v18_v6 = vld [vmem:[%s1241_s0 + $0x10] sm:$0xff] }
  0x18   :  { %827 = vmatpush3.bf16.msra.mxu0 %v927_v22  ;;  %v972_v5 = vld [vmem:[%s1242_s1 + $0x1b8] sm:$0xff]   ;;  %v748_v7 = vcombine.low %v18_v6, %v18_v6  ;;  %v749_v8 = vcombine.high %v18_v6, %v18_v6 }
  0x19   :  { %849 = vmatpush3.bf16.msra.mxu1 %v928_v23  ;;  %828 = vmatprep.subr.bf16.mxu0 %v929_v24  ;;  %v19_v9 = vld [vmem:[%s1241_s0 + $0x18] sm:$0xff] }
  0x1a   :  { %850 = vmatprep.subr.bf16.mxu1 %v930_v25 }
  0x1c   :  { %829 = vmatpush3.bf16.msra.mxu0 %v931_v26 }
  0x1d   :  { %851 = vmatpush3.bf16.msra.mxu1 %v932_v27  ;;  %830 = vmatprep.subr.bf16.mxu0 %v933_v28 }
  0x1e   :  { %852 = vmatprep.subr.bf16.mxu1 %v934_v29 }
  0x20   :  { %831 = vmatpush3.bf16.msra.mxu0 %v935_v30 }
  0x21   :  { %853 = vmatpush3.bf16.msra.mxu1 %v936_v31  ;;  %860 = vmatprep.subr.bf16.mxu0 %v941_v38 }
  0x22   :  { %882 = vmatprep.subr.bf16.mxu1 %v942_v39 }
  0x23   :  { %600 = vmatmul.mubr.bf16.vlgmr.msra.gmra.mrb[0].mxu0 %v744_v34 }
  0x24   :  { %640 = vmatmul.mubr.bf16.vlgmr.msra.gmra.mrb[0].mxu1 %v746_v36  ;;  %861 = vmatpush3.bf16.msra.mxu0 %v943_v40 }
  0x25   :  { %883 = vmatpush3.bf16.msra.mxu1 %v944_v41  ;;  %862 = vmatprep.subr.bf16.mxu0 %v945_v42 }
  0x26   :  { %884 = vmatprep.subr.bf16.mxu1 %v946_v43 }
  0x28   :  { %863 = vmatpush3.bf16.msra.mxu0 %v947_v44 }
  0x29   :  { %885 = vmatpush3.bf16.msra.mxu1 %v948_v45  ;;  %864 = vmatprep.subr.bf16.mxu0 %v949_v46 }
  0x2a   :  { %886 = vmatprep.subr.bf16.mxu1 %v950_v47 }
  0x2c   :  { %865 = vmatpush3.bf16.msra.mxu0 %v951_v48 }
  0x2d   :  { %887 = vmatpush3.bf16.msra.mxu1 %v952_v49  ;;  %866 = vmatprep.subr.bf16.mxu0 %v953_v50 }
  0x2e   :  { %888 = vmatprep.subr.bf16.mxu1 %v954_v51 }
  0x30   :  { %867 = vmatpush3.bf16.msra.mxu0 %v955_v52 }
  0x31   :  { %889 = vmatpush3.bf16.msra.mxu1 %v956_v53  ;;  %868 = vmatprep.subr.bf16.mxu0 %v957_v54 }
  0x32   :  { %890 = vmatprep.subr.bf16.mxu1 %v958_v55 }
  0x34   :  { %869 = vmatpush3.bf16.msra.mxu0 %v959_v56 }
  0x35   :  { %891 = vmatpush3.bf16.msra.mxu1 %v960_v57  ;;  %870 = vmatprep.subr.bf16.mxu0 %v961_v58 }
  0x36   :  { %892 = vmatprep.subr.bf16.mxu1 %v962_v59 }
  0x38   :  { %871 = vmatpush3.bf16.msra.mxu0 %v963_v60 }
  0x39   :  { %893 = vmatpush3.bf16.msra.mxu1 %v964_v61  ;;  %872 = vmatprep.subr.bf16.mxu0 %v965_v62 }
  0x3a   :  { %894 = vmatprep.subr.bf16.mxu1 %v966_v63 }
  0x3c   :  { %873 = vmatpush3.bf16.msra.mxu0 %v967_v0 }
  0x3d   :  { %895 = vmatpush3.bf16.msra.mxu1 %v968_v1  ;;  %874 = vmatprep.subr.bf16.mxu0 %v969_v2 }
  0x3e   :  { %896 = vmatprep.subr.bf16.mxu1 %v970_v3 }
  0x3f   :  { %8 = vsyncpa [#allocation3], 0  ;;  %v750_v10 = vcombine.low %v19_v9, %v19_v9  ;;  %v751_v11 = vcombine.high %v19_v9, %v19_v9  ;;  %679 = vmatprep.mubr.bf16.mxu0 %v749_v8  ;;  %v743_v14 = vld [vmem:[%s1243_s2] ss:$0 sm:$0xff]  ;;  %s1001_s0 = smov [#allocation2]   ;;  %vm727_vm0 = vcmask 261120  }
  0x40   :  { %875 = vmatpush3.bf16.msra.mxu0 %v971_v4  ;;  %s735_s2 = sshll.u32 %s1001_s0, 4  ;;  %s736_s2 = int_to_ptr.vmem [resolvable:$true] %s735_s2 }
  0x41   :  { %897 = vmatpush3.bf16.msra.mxu1 %v972_v5  ;;  %719 = vmatprep.mubr.bf16.mxu1 %v751_v11  ;;  %s977_s14 = scalar_lea.vmem %s736_s2, 128  ;;  %p982_p1 = scmp.lt.s32.totalorder %s736_s2, %s736_s2 }
  0x42   :  { %p978_p0 = scmp.ne.s32.totalorder %s736_s2, %s977_s14  ;;  %p983_p2 = scmp.lt.s32.totalorder %s977_s14, %s977_s14 }
  0x43   :  { %680 = vmatmul.mubr.bf16.vlgmr.msra.gmra.mrb[4].mxu0 %v748_v7 }
  0x44   :  { %720 = vmatmul.mubr.bf16.vlgmr.msra.gmra.mrb[4].mxu1 %v750_v10  ;;  %p984_p3 = por %p983_p2, %p982_p1 }
  0x46   :  { %p985_p4 = pnand %p984_p3, %p978_p0 }
  0xf6   :  { %v832_v12 = vpop.f32.mrb[0].mxu0 }
  0xf7   :  { %v854_v13 = vpop.f32.mrb[0].mxu1  ;;  %v833_v15 = vpop.f32.mrb[1].mxu0 }
  0xf8   :  { %v855_v16 = vpop.f32.mrb[1].mxu1  ;;  %v834_v17 = vadd.f32 %v833_v15, %v832_v12  ;;  %v835_v19 = vpop.f32.mrb[2].mxu0 }
  0xf9   :  { %v856_v18 = vadd.f32 %v855_v16, %v854_v13  ;;  %v857_v20 = vpop.f32.mrb[2].mxu1  ;;  %v836_v21 = vpop.f32.mrb[3].mxu0 }
  0xfa   :  { %v858_v22 = vpop.f32.mrb[3].mxu1  ;;  %v602_v23 = vadd.f32 %v834_v17, %v743_v14 }
  0xfc   :  { %v642_v24 = vadd.f32 %v856_v18, %v602_v23 }
 0x116   :  { %v876_v25 = vpop.f32.mrb[4].mxu0 }
 0x117   :  { %v898_v26 = vpop.f32.mrb[4].mxu1  ;;  %v877_v27 = vpop.f32.mrb[5].mxu0 }
 0x118   :  { %v899_v28 = vpop.f32.mrb[5].mxu1  ;;  %v878_v29 = vadd.f32 %v877_v27, %v876_v25  ;;  %v879_v31 = vpop.f32.mrb[6].mxu0 }
 0x119   :  { %v900_v30 = vadd.f32 %v899_v28, %v898_v26  ;;  %v901_v32 = vpop.f32.mrb[6].mxu1  ;;  %v880_v33 = vpop.f32.mrb[7].mxu0 }
 0x11a   :  { %v902_v34 = vpop.f32.mrb[7].mxu1  ;;  %v682_v35 = vadd.f32 %v878_v29, %v642_v24 }
 0x11c   :  { %v722_v36 = vadd.f32 %v900_v30, %v682_v35 }
 0x11e   :  { %728 = vst.msk [vmem:[#allocation2] sm:$0xff] %vm727_vm0, %v722_v36 }
 0x11f   :  { %988 = shalt.err (!%p985_p4)
}
 0x120   :  { %s989_s17 = scalar_lea.hbm %s1244_s3, 128 }
 0x121   :  { %p990_p5 = scmp.ne.s32.totalorder %s1244_s3, %s989_s17  ;;  %p993_p6 = scmp.lt.u32.totalorder %s989_s17, %s1244_s3 }
 0x123   :  { %p995_p7 = pnand %p993_p6, %p990_p5 }
 0x125   :  { %998 = shalt.err (!%p995_p7)
}
 0x126   :  { %738 = dma.vmem_to_hbm [thread:$0]  %s736_s2, 128, %s1244_s3, [#allocation3]  }
 0x127   :  { %999 = dma.done.wait [#allocation3], 128  }
 0x128   :  { %1000 = vsyncadd [#allocation3], 4294967168 }
 0x129   :  { %742 = vsyncpa [#allocation3], 1 }

</bundles_post_ra>
